<compile_context>
chip_gen: v6e
topology: v6e:2x2x1
jax: 0.10.0
libtpu: 0.0.40
codegen_flags: <defaults>
</compile_context>

<pallas_src>
import jax
import jax.numpy as jnp
from jax.experimental import pallas as pl
from jax.experimental.pallas import tpu as pltpu

# ----------------------------------------------------------------------------
# Hyper-parameters (deterministic, chosen to mirror the module __init__):
#   layers = [fingerprint_length + 1] + dense_layers + [num_bootstrap_heads]
# ----------------------------------------------------------------------------
HPARAMS = {
    "fingerprint_length": 31,       # -> input size 32
    "dense_layers": [64, 32],       # two hidden Linear layers
    "num_bootstrap_heads": 8,       # output size
    "activation": "ReLU",
    "batch_norm": False,            # TODO(synk): BatchNorm1d(1) (train-mode batch
                                    # stats over (N, L)) not implemented; hparams
                                    # set batch_norm=False so forward is exact.
}

_LANE = 128          # TPU lane width; batch tiles must be multiples of this.
_DEFAULT_TB = 512    # default batch-tile width (lane axis); >=512 rows reach
                     # ~85% of HBM roofline while amortizing per-step overhead.


def _round_up(n, m):
    return ((n + m - 1) // m) * m


def _mlp_kernel(xT_ref, w1_ref, b1_ref, w2_ref, b2_ref, w3_ref, b3_ref, oT_ref):
    """Lane-major-on-batch 3-layer MLP: Linear->ReLU->Linear->ReLU->Linear.

    All operands keep the batch on the 128-lane axis, so the (64,TB)/(32,TB)
    intermediates and the final (8,TB) store are lane-dense (no masked
    vst.msk partial stores).  Matmuls run on the MXU with bf16 inputs and f32
    accumulation; bias-add / ReLU stay in f32 on the VPU.
    """
    x = xT_ref[...]                                               # (D_in, TB) bf16
    h = jnp.dot(w1_ref[...], x, preferred_element_type=jnp.float32)
    h = jnp.maximum(h + b1_ref[...], 0.0)                         # (H1, TB) f32
    h = jnp.dot(w2_ref[...], h.astype(w2_ref.dtype),
                preferred_element_type=jnp.float32)
    h = jnp.maximum(h + b2_ref[...], 0.0)                         # (H2, TB) f32
    o = jnp.dot(w3_ref[...], h.astype(w3_ref.dtype),
                preferred_element_type=jnp.float32) + b3_ref[...]
    oT_ref[...] = o.astype(oT_ref.dtype)                          # (D_out, TB) lane-dense


def prepare_params(params):
    """One-time layout/dtype prep (outside the kernel):
    weights -> (out, in) bf16, biases -> (out, 1) f32 column vectors."""
    w1, b1, w2, b2, w3, b3 = params
    prep_w = lambda w: jnp.asarray(w.T, dtype=jnp.bfloat16)
    prep_b = lambda b: jnp.asarray(b, dtype=jnp.float32).reshape(-1, 1)
    return (prep_w(w1), prep_b(b1), prep_w(w2), prep_b(b2), prep_w(w3), prep_b(b3))


def multilayer_network_forward(x, prepared_params, *, tb=_DEFAULT_TB):
    """x: (B, 1, D_in) float32 -> (B, 1, D_out) float32, matching the nn.Sequential."""
    # TODO(synk): for tiny B (< ~1 tile) a plain fused-XLA path would beat any
    # hand kernel; kept on the Pallas path here so the kernel is exercised.
    w1t, b1, w2t, b2, w3t, b3 = prepared_params
    B = x.shape[0]
    d_in = w1t.shape[1]
    d_out = w3t.shape[0]

    # Wrapper-side layout plumbing: batch on the lane axis, activations in bf16
    # (halves HBM traffic for x; accumulation stays f32 inside the kernel).
    x2d = x.reshape(B, d_in)
    xT = x2d.astype(jnp.bfloat16).T                               # (D_in, B)

    # Batch tiling: pad B up to a lane-aligned tile multiple so the last block
    # needs no masking; padded columns are sliced off after the kernel.
    TB = min(tb, _round_up(B, _LANE))
    Bp = _round_up(B, TB)
    if Bp != B:
        xT = jnp.pad(xT, ((0, 0), (0, Bp - B)))
    steps = Bp // TB

    # Weights/biases: constant index_map -> DMA'd once, VMEM-resident across
    # all grid steps (not part of the per-step pipeline).
    resident = lambda arr: pl.BlockSpec(arr.shape, lambda i: (0, 0))

    # Deeper input pipelining only when there are enough steps to hide DMA
    # latency behind the (tiny) per-tile compute.
    if steps >= 3:
        x_spec = pl.BlockSpec((d_in, TB), lambda i: (0, i),
                              pipeline_mode=pl.Buffered(3))
    else:
        x_spec = pl.BlockSpec((d_in, TB), lambda i: (0, i))

    h1, h2 = w1t.shape[0], w2t.shape[0]
    weight_bytes = sum(int(a.size) * a.dtype.itemsize
                       for a in (w1t, b1, w2t, b2, w3t, b3))
    cost = pl.CostEstimate(
        flops=2 * Bp * (d_in * h1 + h1 * h2 + h2 * d_out),
        transcendentals=0,
        bytes_accessed=Bp * d_in * 2 + Bp * d_out * 4 + weight_bytes,
    )

    outT = pl.pallas_call(
        _mlp_kernel,
        out_shape=jax.ShapeDtypeStruct((d_out, Bp), jnp.float32),
        grid_spec=pltpu.PrefetchScalarGridSpec(
            num_scalar_prefetch=0,
            grid=(steps,),
            in_specs=[
                x_spec,
                resident(w1t), resident(b1),
                resident(w2t), resident(b2),
                resident(w3t), resident(b3),
            ],
            out_specs=pl.BlockSpec((d_out, TB), lambda i: (0, i)),
        ),
        compiler_params=pltpu.CompilerParams(
            # batch axis is independent across tiles -> shard over both v7x TCs
            dimension_semantics=("parallel",)),
        cost_estimate=cost,
    )(xT, w1t, b1, w2t, b2, w3t, b3)

    out2d = outT[:, :B].T                                         # (B, D_out) f32
    return out2d.reshape(B, 1, d_out)


def init_params(key, hparams):
    """Deterministic parameter init.  Weights stored as (in, out) so the logical
    compute is x @ W (PyTorch Linear stores (out, in) and computes x @ W.T)."""
    sizes = ([hparams["fingerprint_length"] + 1]
             + hparams["dense_layers"]
             + [hparams["num_bootstrap_heads"]])
    params = []
    keys = jax.random.split(key, len(sizes) - 1)
    for i in range(len(sizes) - 1):
        fan_in, fan_out = sizes[i], sizes[i + 1]
        bound = 1.0 / jnp.sqrt(fan_in)
        wk, bk = jax.random.split(keys[i])
        w = jax.random.uniform(wk, (fan_in, fan_out), jnp.float32, -bound, bound)
        b = jax.random.uniform(bk, (1, fan_out), jnp.float32, -bound, bound)
        params.extend([w, b])
    return tuple(params)


def reference_forward(x, params):
    """Pure-JAX f32 reference of the same MLP (module semantics)."""
    w1, b1, w2, b2, w3, b3 = params
    h = jnp.maximum(x.reshape(x.shape[0], -1) @ w1 + b1, 0.0)
    h = jnp.maximum(h @ w2 + b2, 0.0)
    o = h @ w3 + b3
    return o.reshape(x.shape[0], 1, -1)


def reference_forward_bf16(x, params):
    """Pure-JAX reference emulating the kernel's numerics:
    bf16 matmul inputs, f32 accumulation, f32 bias/ReLU."""
    w1, b1, w2, b2, w3, b3 = params
    bf = lambda a: a.astype(jnp.bfloat16)
    h = x.reshape(x.shape[0], -1)
    h = jnp.maximum(
        jnp.dot(bf(h), bf(w1), preferred_element_type=jnp.float32) + b1, 0.0)
    h = jnp.maximum(
        jnp.dot(bf(h), bf(w2), preferred_element_type=jnp.float32) + b2, 0.0)
    o = jnp.dot(bf(h), bf(w3), preferred_element_type=jnp.float32) + b3
    return o.reshape(x.shape[0], 1, -1)


if __name__ == "__main__":
    key = jax.random.PRNGKey(0)
    pkey, xkey = jax.random.split(key)

    params = init_params(pkey, HPARAMS)
    prepared = prepare_params(params)

    B = 2
    d_in = HPARAMS["fingerprint_length"] + 1
    x = jax.random.normal(xkey, (B, 1, d_in), jnp.float32)

    out = multilayer_network_forward(x, prepared)
    out = jax.block_until_ready(out)

    assert out.shape == (B, 1, HPARAMS["num_bootstrap_heads"]), out.shape

    # Tight check vs a reference that emulates the kernel's bf16/f32 numerics.
    ref_bf16 = reference_forward_bf16(x, params)
    assert jnp.allclose(out, ref_bf16, atol=2e-3, rtol=2e-3), "mismatch vs bf16-emulated reference"

    # Looser sanity check vs the full-f32 module semantics (bf16 matmul inputs
    # loosen the achievable tolerance).
    ref_f32 = reference_forward(x, params)
    assert jnp.allclose(out, ref_f32, atol=1e-1, rtol=1e-1), "mismatch vs f32 reference"

    print("KERNEL_OK")
</pallas_src>

<mosaic_0001>
module attributes {stable_mosaic.version = 11 : i64} {
  func.func @_mlp_kernel(%arg0: i32, %arg1: memref<32x128xbf16, #tpu.memory_space<vmem>>, %arg2: memref<64x32xbf16, #tpu.memory_space<vmem>>, %arg3: memref<64x1xf32, #tpu.memory_space<vmem>>, %arg4: memref<32x64xbf16, #tpu.memory_space<vmem>>, %arg5: memref<32x1xf32, #tpu.memory_space<vmem>>, %arg6: memref<8x32xbf16, #tpu.memory_space<vmem>>, %arg7: memref<8x1xf32, #tpu.memory_space<vmem>>, %arg8: memref<8x128xf32, #tpu.memory_space<vmem>>) attributes {dimension_semantics = [#tpu.dimension_semantics<parallel>], iteration_bounds = array<i64: 1>, scalar_prefetch = 0 : i64, scratch_operands = 0 : i64, tpu.core_type = #tpu.core_type<tc>, window_params = [{transform_indices = @transform_0, window_bounds = array<i64: 32, 128>}, {pipeline_mode = #tpu.pipeline_mode<synchronous>, transform_indices = @transform_1, window_bounds = array<i64: 64, 32>}, {pipeline_mode = #tpu.pipeline_mode<synchronous>, transform_indices = @transform_2, window_bounds = array<i64: 64, 1>}, {pipeline_mode = #tpu.pipeline_mode<synchronous>, transform_indices = @transform_3, window_bounds = array<i64: 32, 64>}, {pipeline_mode = #tpu.pipeline_mode<synchronous>, transform_indices = @transform_4, window_bounds = array<i64: 32, 1>}, {pipeline_mode = #tpu.pipeline_mode<synchronous>, transform_indices = @transform_5, window_bounds = array<i64: 8, 32>}, {pipeline_mode = #tpu.pipeline_mode<synchronous>, transform_indices = @transform_6, window_bounds = array<i64: 8, 1>}, {transform_indices = @transform_7, window_bounds = array<i64: 8, 128>}]} {
    %c0 = arith.constant 0 : index
    %c0_0 = arith.constant 0 : index
    %0 = vector.load %arg1[%c0, %c0_0] : memref<32x128xbf16, #tpu.memory_space<vmem>>, vector<32x128xbf16>
    %c0_1 = arith.constant 0 : index
    %c0_2 = arith.constant 0 : index
    %1 = vector.load %arg2[%c0_1, %c0_2] : memref<64x32xbf16, #tpu.memory_space<vmem>>, vector<64x32xbf16>
    %cst = arith.constant dense<0.000000e+00> : vector<64x128xf32>
    %2 = tpu.matmul %1, %0, %cst {dimension_numbers = #tpu.dot_dimension_numbers<[1], [0], [0], [1], [0, 0, 1, 1], [], []>} : vector<64x32xbf16>, vector<32x128xbf16>, vector<64x128xf32> -> vector<64x128xf32>
    %c0_3 = arith.constant 0 : index
    %c0_4 = arith.constant 0 : index
    %3 = vector.load %arg3[%c0_3, %c0_4] : memref<64x1xf32, #tpu.memory_space<vmem>>, vector<64x1xf32>
    %4 = vector.broadcast %3 : vector<64x1xf32> to vector<64x128xf32>
    %5 = arith.addf %2, %4 : vector<64x128xf32>
    %cst_5 = arith.constant 0.000000e+00 : f32
    %6 = vector.broadcast %cst_5 : f32 to vector<64x128xf32>
    %7 = arith.maximumf %5, %6 : vector<64x128xf32>
    %c0_6 = arith.constant 0 : index
    %c0_7 = arith.constant 0 : index
    %8 = vector.load %arg4[%c0_6, %c0_7] : memref<32x64xbf16, #tpu.memory_space<vmem>>, vector<32x64xbf16>
    %9 = arith.truncf %7 : vector<64x128xf32> to vector<64x128xbf16>
    %cst_8 = arith.constant dense<0.000000e+00> : vector<32x128xf32>
    %10 = tpu.matmul %8, %9, %cst_8 {dimension_numbers = #tpu.dot_dimension_numbers<[1], [0], [0], [1], [0, 0, 1, 1], [], []>} : vector<32x64xbf16>, vector<64x128xbf16>, vector<32x128xf32> -> vector<32x128xf32>
    %c0_9 = arith.constant 0 : index
    %c0_10 = arith.constant 0 : index
    %11 = vector.load %arg5[%c0_9, %c0_10] : memref<32x1xf32, #tpu.memory_space<vmem>>, vector<32x1xf32>
    %12 = vector.broadcast %11 : vector<32x1xf32> to vector<32x128xf32>
    %13 = arith.addf %10, %12 : vector<32x128xf32>
    %cst_11 = arith.constant 0.000000e+00 : f32
    %14 = vector.broadcast %cst_11 : f32 to vector<32x128xf32>
    %15 = arith.maximumf %13, %14 : vector<32x128xf32>
    %c0_12 = arith.constant 0 : index
    %c0_13 = arith.constant 0 : index
    %16 = vector.load %arg6[%c0_12, %c0_13] : memref<8x32xbf16, #tpu.memory_space<vmem>>, vector<8x32xbf16>
    %17 = arith.truncf %15 : vector<32x128xf32> to vector<32x128xbf16>
    %cst_14 = arith.constant dense<0.000000e+00> : vector<8x128xf32>
    %18 = tpu.matmul %16, %17, %cst_14 {dimension_numbers = #tpu.dot_dimension_numbers<[1], [0], [0], [1], [0, 0, 1, 1], [], []>} : vector<8x32xbf16>, vector<32x128xbf16>, vector<8x128xf32> -> vector<8x128xf32>
    %c0_15 = arith.constant 0 : index
    %c0_16 = arith.constant 0 : index
    %19 = vector.load %arg7[%c0_15, %c0_16] : memref<8x1xf32, #tpu.memory_space<vmem>>, vector<8x1xf32>
    %20 = vector.broadcast %19 : vector<8x1xf32> to vector<8x128xf32>
    %21 = arith.addf %18, %20 : vector<8x128xf32>
    %c0_17 = arith.constant 0 : index
    %c0_18 = arith.constant 0 : index
    %22 = vector.load %arg8[%c0_17, %c0_18] : memref<8x128xf32, #tpu.memory_space<vmem>>, vector<8x128xf32>
    tpu.vector_store %arg8[%c0_17, %c0_18], %21 {strides = array<i32>} : memref<8x128xf32, #tpu.memory_space<vmem>>, vector<8x128xf32>,
    return
  }
  func.func @transform_0(%arg0: i32) -> (i32, i32) {
    %c0_i32 = arith.constant 0 : i32
    %c0_i32_0 = arith.constant 0 : i32
    return %c0_i32, %arg0 : i32, i32
  }
  func.func @transform_1(%arg0: i32) -> (i32, i32) {
    %c0_i32 = arith.constant 0 : i32
    %c0_i32_0 = arith.constant 0 : i32
    %c0_i32_1 = arith.constant 0 : i32
    return %c0_i32, %c0_i32_0 : i32, i32
  }
  func.func @transform_2(%arg0: i32) -> (i32, i32) {
    %c0_i32 = arith.constant 0 : i32
    %c0_i32_0 = arith.constant 0 : i32
    %c0_i32_1 = arith.constant 0 : i32
    return %c0_i32, %c0_i32_0 : i32, i32
  }
  func.func @transform_3(%arg0: i32) -> (i32, i32) {
    %c0_i32 = arith.constant 0 : i32
    %c0_i32_0 = arith.constant 0 : i32
    %c0_i32_1 = arith.constant 0 : i32
    return %c0_i32, %c0_i32_0 : i32, i32
  }
  func.func @transform_4(%arg0: i32) -> (i32, i32) {
    %c0_i32 = arith.constant 0 : i32
    %c0_i32_0 = arith.constant 0 : i32
    %c0_i32_1 = arith.constant 0 : i32
    return %c0_i32, %c0_i32_0 : i32, i32
  }
  func.func @transform_5(%arg0: i32) -> (i32, i32) {
    %c0_i32 = arith.constant 0 : i32
    %c0_i32_0 = arith.constant 0 : i32
    %c0_i32_1 = arith.constant 0 : i32
    return %c0_i32, %c0_i32_0 : i32, i32
  }
  func.func @transform_6(%arg0: i32) -> (i32, i32) {
    %c0_i32 = arith.constant 0 : i32
    %c0_i32_0 = arith.constant 0 : i32
    %c0_i32_1 = arith.constant 0 : i32
    return %c0_i32, %c0_i32_0 : i32, i32
  }
  func.func @transform_7(%arg0: i32) -> (i32, i32) {
    %c0_i32 = arith.constant 0 : i32
    %c0_i32_0 = arith.constant 0 : i32
    return %c0_i32, %arg0 : i32, i32
  }
}

</mosaic_0001>

<bundles_post_ra>
// kernel: tpu_custom_call.1
= control target key start
LH: loop header
LB: loop body
LE: loop exit
PB: predicated region body
PF: predicated region fallthrough
CT: control target
= control target key end

     0   :  { %vm120_vm0 = vcmask 261120   ;;  %v473_v3 = vmov 0   ;;  %s593_s0 = inlined_call_operand.vmem [shape: bf16[32,128], index: 0, kind: input, shape index: {}]   ;;  %s594_s1 = inlined_call_operand.vmem [shape: bf16[64,32], index: 1, kind: input, shape index: {}]   ;;  %s595_s2 = inlined_call_operand.vmem [shape: f32[64,1], index: 2, kind: input, shape index: {}]   ;;  %s596_s3 = inlined_call_operand.vmem [shape: bf16[32,64], index: 3, kind: input, shape index: {}]   ;;  %s597_s4 = inlined_call_operand.vmem [shape: f32[32,1], index: 4, kind: input, shape index: {}]   ;;  %s598_s5 = inlined_call_operand.vmem [shape: bf16[8,32], index: 5, kind: input, shape index: {}]   ;;  %s599_s6 = inlined_call_operand.vmem [shape: f32[8,1], index: 6, kind: input, shape index: {}]   ;;  %s600_s7 = inlined_call_operand.hbm [shape: f32[8,128], index: 7, kind: output, shape index: {}]  }
   0x1   :  { %v443_v0 = vld [vmem:[%s593_s0 + $0x8] sm:$0xff]   ;;  %v444_v1 = vld [vmem:[%s593_s0] sm:$0xff]   ;;  %441 = vset.pattern.permute.xlu0 %v473_v3  ;;  %442 = vset.pattern.permute.xlu1 %v473_v3  ;;  %v46_v5 = vld [vmem:[%s595_s2 + $0x30] sm:$0xff] }
   0x2   :  { %405 = vmatprep.subr.bf16.mxu0 %v443_v0  ;;  %v445_v2 = vld [vmem:[%s594_s1] sm:$0xff]   ;;  %v446_v4 = vld [vmem:[%s594_s1 + $0x8] sm:$0xff]   ;;  %v447_v7 = vld [vmem:[%s594_s1 + $0x10] sm:$0xff]   ;;  %80 = vperm.xlu0 %441, %v46_v5  }
   0x3   :  { %406 = vmatpush3.bf16.msra.mxu0 %v443_v0  ;;  %409 = vmatprep.mubr.msk.bf16.mxu0 %vm120_vm0, %v445_v2  ;;  %v44_v6 = vld [vmem:[%s595_s2 + $0x20] sm:$0xff]  ;;  %v47_v8 = vld [vmem:[%s595_s2 + $0x38] sm:$0xff]  ;;  %v45_v9 = vld [vmem:[%s595_s2 + $0x28] sm:$0xff] }
   0x4   :  { %407 = vmatprep.subr.bf16.mxu0 %v444_v1  ;;  %70 = vperm.xlu1 %442, %v44_v6  }
   0x6   :  { %85 = vperm.xlu0 %441, %v47_v8  }
   0x7   :  { %408 = vmatpush3.bf16.msra.mxu0 %v444_v1 }
   0xa   :  { %410 = vmatmul.mubr.msk.bf16.vlgmr.msra.gmra.mxu0 %vm120_vm0, %v446_v4 }
   0xb   :  { %413 = vmatprep.mubr.msk.bf16.mxu0 %vm120_vm0, %v447_v7 }
   0xc   :  { %12 = vsyncpa [#allocation3], 0  ;;  %v42_v10 = vld [vmem:[%s595_s2 + $0x10] sm:$0xff]  ;;  %75 = vperm.xlu1 %442, %v45_v9   ;;  %v43_v11 = vld [vmem:[%s595_s2 + $0x18] sm:$0xff]  ;;  %vm248_vm1 = vcmask 523264   ;;  %v474_v58 = vmov 0.0  }
   0xd   :  { %v448_v12 = vld [vmem:[%s594_s1 + $0x18] sm:$0xff]   ;;  %60 = vperm.xlu0 %441, %v42_v10   ;;  %v40_v13 = vld [vmem:[%s595_s2] sm:$0xff]  ;;  %v41_v14 = vld [vmem:[%s595_s2 + $0x8] sm:$0xff]  ;;  %429 = vmatprep.subr.bf16.mxu0 %v474_v58  ;;  %vm475_vm2 = vmmov 0   ;;  %s476_s15 = smov [#allocation2]  }
   0xe   :  { %v216_v15 = vld [vmem:[%s597_s4 + $0x10] sm:$0xff]  ;;  %v217_v16 = vld [vmem:[%s597_s4 + $0x18] sm:$0xff]  ;;  %v214_v17 = vld [vmem:[%s597_s4] sm:$0xff]  ;;  %s367_s16 = sshll.u32 %s476_s15, 4  ;;  %s368_s16 = int_to_ptr.vmem [resolvable:$true] %s367_s16 }
   0xf   :  { %v215_v18 = vld [vmem:[%s597_s4 + $0x8] sm:$0xff]  ;;  %v311_v19 = vld [vmem:[%s599_s6] sm:$0xff]  ;;  %s451_s17 = scalar_lea.vmem %s368_s16, 128  ;;  %p456_p1 = scmp.lt.s32.totalorder %s368_s16, %s368_s16 }
  0x10   :  { %65 = vperm.xlu1 %442, %v43_v11   ;;  %v449_v20 = vld [vmem:[%s596_s3] sm:$0xff]   ;;  %v450_v57 = vld [vmem:[%s596_s3 + $0x8] sm:$0xff]   ;;  %p452_p0 = scmp.ne.s32.totalorder %s368_s16, %s451_s17  ;;  %p457_p2 = scmp.lt.s32.totalorder %s451_s17, %s451_s17 }
  0x11   :  { %50 = vperm.xlu0 %441, %v40_v13   ;;  %425 = vmatprep.mubr.msk.bf16.mxu1 %vm248_vm1, %v449_v20  ;;  %v308_v13 = vld [vmem:[%s598_s5] sm:$0xf] }
  0x12   :  { %414 = vmatmul.mubr.msk.bf16.gmra.mxu0 %vm120_vm0, %v448_v12  ;;  %p458_p3 = por %p457_p2, %p456_p1 }
  0x13   :  { %433 = vmatprep.mubr.msk.bf16.mxu0 %vm475_vm2, %v474_v58 }
  0x14   :  { %55 = vperm.xlu1 %442, %v41_v14   ;;  %p459_p4 = pnand %p458_p3, %p452_p0 }
  0x15   :  { %230 = vperm.xlu0 %441, %v216_v15  }
  0x18   :  { %235 = vperm.xlu1 %442, %v217_v16  }
  0x19   :  { %220 = vperm.xlu0 %441, %v214_v17  }
  0x1c   :  { %225 = vperm.xlu1 %442, %v215_v18  }
  0x1d   :  { %314 = vperm.xlu0 %441, %v311_v19  }
  0x7d   :  { %v81_v23 = vpop.permute.xlu0 %80 }
  0x7f   :  { %v71_v21 = vpop.permute.xlu1 %70 }
  0x81   :  { %v86_v28 = vpop.permute.xlu0 %85 }
  0x87   :  { %v76_v26 = vpop.permute.xlu1 %75 }
  0x88   :  { %v61_v36 = vpop.permute.xlu0 %60 }
  0x8b   :  { %v66_v32 = vpop.permute.xlu1 %65 }
  0x8c   :  { %v51_v50 = vpop.permute.xlu0 %50 }
  0x8f   :  { %v56_v46 = vpop.permute.xlu1 %55 }
  0x90   :  { %v231_v59 = vpop.permute.xlu0 %230 }
  0x93   :  { %v236_v60 = vpop.permute.xlu1 %235 }
  0x94   :  { %v221_v1 = vpop.permute.xlu0 %220 }
  0x97   :  { %v226_v3 = vpop.permute.xlu1 %225 }
  0x98   :  { %v315_v14 = vpop.permute.xlu0 %314 }
  0xca   :  { %v411_v22 = vpop.f32.mrf.mxu0 }
  0xcb   :  { %v176_v42 = vadd.f32 %v411_v22, %v61_v36 }
  0xcc   :  { %v167_v24 = vpop.f32.mrf.mxu0 }
  0xcd   :  { %v200_v51 = vmax.f32 %v176_v42, 0.0  ;;  %v168_v52 = vadd.f32 %v167_v24, %v51_v50 }
  0xce   :  { %v412_v25 = vpop.f32.mrf.mxu0 }
  0xcf   :  { %v179_v38 = vadd.f32 %v412_v25, %v66_v32  ;;  %v198_v55 = vmax.f32 %v168_v52, 0.0 }
  0xd0   :  { %v170_v27 = vpop.f32.mrf.mxu0 }
  0xd1   :  { %v201_v47 = vmax.f32 %v179_v38, 0.0  ;;  %v171_v48 = vadd.f32 %v170_v27, %v56_v46 }
  0xd2   :  { %v415_v29 = vpop.f32.mrf.mxu0 }
  0xd3   :  { %v192_v31 = vadd.f32 %v415_v29, %v81_v23  ;;  %v211_v53 = vpack.c.bf16 %v201_v47, %v200_v51  ;;  %v199_v54 = vmax.f32 %v171_v48, 0.0 }
  0xd4   :  { %v183_v30 = vpop.f32.mrf.mxu0 }
  0xd5   :  { %v184_v34 = vadd.f32 %v183_v30, %v71_v21  ;;  %v204_v39 = vmax.f32 %v192_v31, 0.0  ;;  %v210_v56 = vpack.c.bf16 %v199_v54, %v198_v55 }
  0xd6   :  { %v416_v33 = vpop.f32.mrf.mxu0 }
  0xd7   :  { %v195_v35 = vadd.f32 %v416_v33, %v86_v28  ;;  %v202_v43 = vmax.f32 %v184_v34, 0.0 }
  0xd8   :  { %v186_v37 = vpop.f32.mrf.mxu0 }
  0xd9   :  { %v205_v40 = vmax.f32 %v195_v35, 0.0  ;;  %v187_v41 = vadd.f32 %v186_v37, %v76_v26 }
  0xdb   :  { %v203_v44 = vmax.f32 %v187_v41, 0.0  ;;  %v213_v45 = vpack.c.bf16 %v205_v40, %v204_v39 }
  0xdd   :  { %v212_v49 = vpack.c.bf16 %v203_v44, %v202_v43  ;;  %417 = vmatprep.subr.bf16.mxu1 %v213_v45 }
  0xde   :  { %418 = vmatpush3.bf16.msra.mxu1 %v213_v45 }
  0xdf   :  { %419 = vmatprep.subr.bf16.mxu1 %v212_v49 }
  0xe2   :  { %420 = vmatpush3.bf16.msra.mxu1 %v212_v49 }
  0xe3   :  { %421 = vmatprep.subr.bf16.mxu1 %v211_v53 }
  0xe6   :  { %422 = vmatpush3.bf16.msra.mxu1 %v211_v53 }
  0xe7   :  { %423 = vmatprep.subr.bf16.mxu1 %v210_v56 }
  0xea   :  { %424 = vmatpush3.bf16.msra.mxu1 %v210_v56 }
  0xed   :  { %426 = vmatmul.mubr.msk.bf16.vlgmr.msra.gmra.mxu1 %vm248_vm1, %v450_v57 }
 0x1ad   :  { %v427_v61 = vpop.f32.mrf.mxu1 }
 0x1ae   :  { %v298_v63 = vadd.f32 %v427_v61, %v231_v59 }
 0x1af   :  { %v289_v62 = vpop.f32.mrf.mxu1 }
 0x1b0   :  { %v306_v5 = vmax.f32 %v298_v63, 0.0  ;;  %v290_v6 = vadd.f32 %v289_v62, %v221_v1 }
 0x1b1   :  { %v428_v0 = vpop.f32.mrf.mxu1 }
 0x1b2   :  { %v301_v2 = vadd.f32 %v428_v0, %v236_v60  ;;  %v304_v11 = vmax.f32 %v290_v6, 0.0 }
 0x1b3   :  { %v292_v4 = vpop.f32.mrf.mxu1 }
 0x1b4   :  { %v307_v7 = vmax.f32 %v301_v2, 0.0  ;;  %v293_v8 = vadd.f32 %v292_v4, %v226_v3 }
 0x1b6   :  { %v310_v9 = vpack.c.bf16 %v307_v7, %v306_v5  ;;  %v305_v10 = vmax.f32 %v293_v8, 0.0 }
 0x1b8   :  { %430 = vmatpush3.bf16.msra.mxu0 %v310_v9  ;;  %v309_v12 = vpack.c.bf16 %v305_v10, %v304_v11 }
 0x1b9   :  { %431 = vmatprep.subr.bf16.mxu0 %v474_v58 }
 0x1bc   :  { %432 = vmatpush3.bf16.msra.mxu0 %v309_v12 }
 0x1bf   :  { %434 = vmatmul.mubr.msk.bf16.vlgmr.msra.gmra.mxu0 %vm120_vm0, %v308_v13 }
 0x27f   :  { %v354_v15 = vpop.f32.mrf.mxu0 }
 0x280   :  { %v355_v16 = vadd.f32 %v354_v15, %v315_v14 }
 0x281   :  { %v435_v17 = vpop.f32.mrf.mxu0 }
 0x282   :  { %360 = vst [vmem:[#allocation2] sm:$0xff] %v355_v16 }
 0x283   :  { %v357_v18 = vpop.f32.mrf.mxu0 }
 0x284   :  { %462 = shalt.err (!%p459_p4)
}
 0x285   :  { %370 = dma.vmem_to_hbm [thread:$0]  %s368_s16, 128, %s600_s7, [#allocation3]   ;;  %v436_v19 = vpop.f32.mrf.mxu0 }
 0x286   :  { %471 = dma.done.wait [#allocation3], 128  }
 0x287   :  { %472 = vsyncadd [#allocation3], 4294967168 }
 0x288   :  { %374 = vsyncpa [#allocation3], 1 }

</bundles_post_ra>
